<compile_context>
chip_gen: v7x
topology: tpu7x:2x2x1
jax: 0.10.0
libtpu: 0.0.40
codegen_flags: <defaults>
</compile_context>

<pallas_src>
import functools
import math

import jax
import jax.numpy as jnp
import numpy as np
from jax.experimental import pallas as pl
from jax.experimental.pallas import tpu as pltpu


def _encoder_layer_kernel(x_ref,
                          wq_ref, bq_ref, wk_ref, bk_ref, wv_ref, bv_ref,
                          wo_ref, bo_ref, w1_ref, b1_ref, w2_ref, b2_ref,
                          out_ref, acc_ref,
                          *, num_heads, compute_dtype):
    """One grid step = (one batch element, one attention head)."""
    h = pl.program_id(1)

    @pl.when(h == 0)
    def _init():
        acc_ref[...] = jnp.zeros_like(acc_ref)

    x = x_ref[0].astype(compute_dtype)                               # (S, D)

    # Per-head projections. Weights are already W^T per-head slices (D, depth)
    # and the 1/sqrt(depth) scale is folded into Wq / bq on the host.
    q = jnp.dot(x, wq_ref[0], preferred_element_type=jnp.float32) + bq_ref[0]
    k = jnp.dot(x, wk_ref[0], preferred_element_type=jnp.float32) + bk_ref[0]
    v = jnp.dot(x, wv_ref[0], preferred_element_type=jnp.float32) + bv_ref[0]

    # scores_h = (Q_h * scale) @ K_h^T, expressed as a dot_general contracting
    # the depth axis of both operands (no explicit in-kernel transpose).
    scores = jax.lax.dot_general(
        q.astype(compute_dtype), k.astype(compute_dtype),
        dimension_numbers=(((1,), (1,)), ((), ())),
        preferred_element_type=jnp.float32)                           # (S, S)

    # Numerically-stable softmax in f32; reciprocal on the EUP slot.
    m = jnp.max(scores, axis=-1, keepdims=True)
    e = jnp.exp(scores - m)
    denom = jnp.sum(e, axis=-1, keepdims=True)
    approx = compute_dtype != jnp.float32     # exact on the f32 parity path
    attn = e * pl.reciprocal(denom, approx=approx)                    # (S, S)

    ctx = jnp.dot(attn.astype(compute_dtype), v.astype(compute_dtype),
                  preferred_element_type=jnp.float32)                 # (S, depth)

    # Accumulate the output projection per head: no concatenate / lane slices.
    acc_ref[...] += jnp.dot(ctx.astype(compute_dtype), wo_ref[0],
                            preferred_element_type=jnp.float32)       # (S, D)

    @pl.when(h == num_heads - 1)
    def _finalize():
        attn_out = acc_ref[...] + bo_ref[...]                         # (S, D)
        hdn = jnp.dot(attn_out.astype(compute_dtype), w1_ref[...],
                      preferred_element_type=jnp.float32) + b1_ref[...]
        hdn = jnp.maximum(hdn, 0.0)                                   # ReLU
        y = jnp.dot(hdn.astype(compute_dtype), w2_ref[...],
                    preferred_element_type=jnp.float32) + b2_ref[...]
        out_ref[0] = y.astype(out_ref.dtype)

    # TODO(synk): the optional additive attention `mask` of the torch forward
    # is not wired in (the encoder layer call uses mask=None).
    # TODO(synk): for production shapes (S >= 1024) add a query-tile grid axis
    # with an online-softmax accumulator and set vmem_limit_bytes explicitly.


def transformer_encoder_layer(x, params, *, num_heads, compute_dtype=jnp.float32):
    """Fused TransformerEncoderLayer forward (MHA + positionwise FFN)."""
    B, S, D = x.shape
    assert D % num_heads == 0
    depth = D // num_heads
    wq, bq, wk, bk, wv, bv, wo, bo, w1, b1, w2, b2 = params
    d_ff = w1.shape[0]
    scale = 1.0 / math.sqrt(depth)

    # ---- host-side layout plumbing (free): transpose + per-head split ------
    def qkv_heads(w):              # torch (D_out, D_in) -> (H, D_in, depth) = W^T per head
        return w.T.reshape(D, num_heads, depth).transpose(1, 0, 2)

    wq_h = (qkv_heads(wq) * scale).astype(compute_dtype)   # scale folded into Q proj
    wk_h = qkv_heads(wk).astype(compute_dtype)
    wv_h = qkv_heads(wv).astype(compute_dtype)
    bq_h = (bq * scale).reshape(num_heads, 1, depth)        # biases stay f32
    bk_h = bk.reshape(num_heads, 1, depth)
    bv_h = bv.reshape(num_heads, 1, depth)
    wo_h = wo.T.reshape(num_heads, depth, D).astype(compute_dtype)   # (H, depth, D)
    bo2 = bo.reshape(1, D)
    w1t = w1.T.astype(compute_dtype)                         # (D, d_ff)
    b1r = b1.reshape(1, d_ff)
    w2t = w2.T.astype(compute_dtype)                         # (d_ff, D)
    b2r = b2.reshape(1, D)

    kernel = functools.partial(_encoder_layer_kernel,
                               num_heads=num_heads, compute_dtype=compute_dtype)

    head_w_spec = pl.BlockSpec((1, D, depth), lambda b, h: (h, 0, 0))
    head_b_spec = pl.BlockSpec((1, 1, depth), lambda b, h: (h, 0, 0))

    cost = pl.CostEstimate(
        flops=int(2 * B * S * D * D * 4                  # QKV + out projection
                  + 2 * B * num_heads * S * S * depth * 2  # scores + attn@V
                  + 2 * B * S * D * d_ff * 2),             # FFN
        transcendentals=int(B * num_heads * S * S),
        bytes_accessed=int(4 * (2 * B * S * D + 4 * D * D + 2 * D * d_ff
                                + 4 * D + d_ff)),
    )

    return pl.pallas_call(
        kernel,
        out_shape=jax.ShapeDtypeStruct((B, S, D), jnp.float32),
        grid_spec=pltpu.PrefetchScalarGridSpec(
            num_scalar_prefetch=0,
            grid=(B, num_heads),
            in_specs=[
                pl.BlockSpec((1, S, D), lambda b, h: (b, 0, 0)),       # x
                head_w_spec, head_b_spec,                              # Wq^T, bq (scaled)
                head_w_spec, head_b_spec,                              # Wk^T, bk
                head_w_spec, head_b_spec,                              # Wv^T, bv
                pl.BlockSpec((1, depth, D), lambda b, h: (h, 0, 0)),   # Wo^T per head
                pl.BlockSpec((1, D), lambda b, h: (0, 0)),             # bo
                pl.BlockSpec((D, d_ff), lambda b, h: (0, 0)),          # W1^T
                pl.BlockSpec((1, d_ff), lambda b, h: (0, 0)),          # b1
                pl.BlockSpec((d_ff, D), lambda b, h: (0, 0)),          # W2^T
                pl.BlockSpec((1, D), lambda b, h: (0, 0)),             # b2
            ],
            out_specs=pl.BlockSpec((1, S, D), lambda b, h: (b, 0, 0)),
            scratch_shapes=[pltpu.VMEM((S, D), jnp.float32)],
        ),
        compiler_params=pltpu.CompilerParams(
            dimension_semantics=("parallel", "arbitrary")),
        cost_estimate=cost,
    )(x, wq_h, bq_h, wk_h, bk_h, wv_h, bv_h, wo_h, bo2, w1t, b1r, w2t, b2r)


def _reference_encoder_layer(x, params, *, num_heads):
    """Pure-JAX reference matching the PyTorch TransformerEncoderLayer.forward."""
    wq, bq, wk, bk, wv, bv, wo, bo, w1, b1, w2, b2 = params
    B, S, D = x.shape
    depth = D // num_heads

    def split(t):
        return t.reshape(B, S, num_heads, depth).transpose(0, 2, 1, 3)

    Q = split(x @ wq.T + bq)
    K = split(x @ wk.T + bk)
    V = split(x @ wv.T + bv)
    scores = jnp.einsum("bhqd,bhkd->bhqk", Q, K) / jnp.sqrt(jnp.float32(depth))
    attn = jax.nn.softmax(scores, axis=-1)
    ctx = jnp.einsum("bhqk,bhkd->bhqd", attn, V)
    ctx = ctx.transpose(0, 2, 1, 3).reshape(B, S, D)
    attn_out = ctx @ wo.T + bo
    hdn = jax.nn.relu(attn_out @ w1.T + b1)
    return hdn @ w2.T + b2


if __name__ == "__main__":
    # small shapes consistent with the module (d_model % num_heads == 0, d_ff = 4*d_model)
    B, S, D, H = 2, 8, 32, 4
    d_ff = 128

    key0 = jax.random.PRNGKey(0)
    keys = jax.random.split(key0, 13)

    def linear_init(kw, kb, fan_in, fan_out):
        # deterministic torch-Linear-style init: U(-1/sqrt(fan_in), 1/sqrt(fan_in))
        bound = 1.0 / math.sqrt(fan_in)
        w = jax.random.uniform(kw, (fan_out, fan_in), jnp.float32, -bound, bound)
        b = jax.random.uniform(kb, (fan_out,), jnp.float32, -bound, bound)
        return w, b

    wq, bq = linear_init(keys[0], keys[1], D, D)
    wk, bk = linear_init(keys[2], keys[3], D, D)
    wv, bv = linear_init(keys[4], keys[5], D, D)
    wo, bo = linear_init(keys[6], keys[7], D, D)
    w1, b1 = linear_init(keys[8], keys[9], D, d_ff)
    w2, b2 = linear_init(keys[10], keys[11], d_ff, D)
    params = (wq, bq, wk, bk, wv, bv, wo, bo, w1, b1, w2, b2)

    x = jax.random.normal(keys[12], (B, S, D), jnp.float32)

    ref = _reference_encoder_layer(x, params, num_heads=H)

    # f32 path: reference-parity numerics.
    out_f32 = jax.block_until_ready(
        transformer_encoder_layer(x, params, num_heads=H,
                                  compute_dtype=jnp.float32))
    assert out_f32.shape == (B, S, D)
    np.testing.assert_allclose(np.asarray(out_f32), np.asarray(ref),
                               rtol=1e-4, atol=1e-4)

    # bf16 MXU fast path (v6e/v7x): bf16 matmul operands, f32 accumulate/softmax.
    out_bf16 = jax.block_until_ready(
        transformer_encoder_layer(x, params, num_heads=H,
                                  compute_dtype=jnp.bfloat16))
    np.testing.assert_allclose(np.asarray(out_bf16), np.asarray(ref),
                               rtol=5e-2, atol=5e-2)

    print("KERNEL_OK")
</pallas_src>

<mosaic_0001>
module attributes {stable_mosaic.version = 11 : i64} {
  func.func @_encoder_layer_kernel(%arg0: i32, %arg1: i32, %arg2: memref<1x8x32xf32, #tpu.memory_space<vmem>>, %arg3: memref<1x32x8xf32, #tpu.memory_space<vmem>>, %arg4: memref<1x1x8xf32, #tpu.memory_space<vmem>>, %arg5: memref<1x32x8xf32, #tpu.memory_space<vmem>>, %arg6: memref<1x1x8xf32, #tpu.memory_space<vmem>>, %arg7: memref<1x32x8xf32, #tpu.memory_space<vmem>>, %arg8: memref<1x1x8xf32, #tpu.memory_space<vmem>>, %arg9: memref<1x8x32xf32, #tpu.memory_space<vmem>>, %arg10: memref<1x32xf32, #tpu.memory_space<vmem>>, %arg11: memref<32x128xf32, #tpu.memory_space<vmem>>, %arg12: memref<1x128xf32, #tpu.memory_space<vmem>>, %arg13: memref<128x32xf32, #tpu.memory_space<vmem>>, %arg14: memref<1x32xf32, #tpu.memory_space<vmem>>, %arg15: memref<1x8x32xf32, #tpu.memory_space<vmem>>, %arg16: memref<8x32xf32, #tpu.memory_space<vmem>>) attributes {dimension_semantics = [#tpu.dimension_semantics<parallel>, #tpu.dimension_semantics<arbitrary>], iteration_bounds = array<i64: 2, 4>, scalar_prefetch = 0 : i64, scratch_operands = 1 : i64, tpu.core_type = #tpu.core_type<tc>, window_params = [{transform_indices = @transform_0, window_bounds = array<i64: 1, 8, 32>}, {transform_indices = @transform_1, window_bounds = array<i64: 1, 32, 8>}, {transform_indices = @transform_2, window_bounds = array<i64: 1, 1, 8>}, {transform_indices = @transform_3, window_bounds = array<i64: 1, 32, 8>}, {transform_indices = @transform_4, window_bounds = array<i64: 1, 1, 8>}, {transform_indices = @transform_5, window_bounds = array<i64: 1, 32, 8>}, {transform_indices = @transform_6, window_bounds = array<i64: 1, 1, 8>}, {transform_indices = @transform_7, window_bounds = array<i64: 1, 8, 32>}, {pipeline_mode = #tpu.pipeline_mode<synchronous>, transform_indices = @transform_8, window_bounds = array<i64: 1, 32>}, {pipeline_mode = #tpu.pipeline_mode<synchronous>, transform_indices = @transform_9, window_bounds = array<i64: 32, 128>}, {pipeline_mode = #tpu.pipeline_mode<synchronous>, transform_indices = @transform_10, window_bounds = array<i64: 1, 128>}, {pipeline_mode = #tpu.pipeline_mode<synchronous>, transform_indices = @transform_11, window_bounds = array<i64: 128, 32>}, {pipeline_mode = #tpu.pipeline_mode<synchronous>, transform_indices = @transform_12, window_bounds = array<i64: 1, 32>}, {transform_indices = @transform_13, window_bounds = array<i64: 1, 8, 32>}]} {
    %c0_i32 = arith.constant 0 : i32
    %0 = arith.cmpi eq, %arg1, %c0_i32 : i32
    %1 = arith.extui %0 : i1 to i32
    %c0_i32_0 = arith.constant 0 : i32
    %2 = arith.cmpi ne, %1, %c0_i32_0 : i32
    scf.if %2 {
      %cst_36 = arith.constant 0.000000e+00 : f32
      %47 = vector.broadcast %cst_36 : f32 to vector<8x32xf32>
      %c0_37 = arith.constant 0 : index
      %c0_38 = arith.constant 0 : index
      %48 = vector.load %arg16[%c0_37, %c0_38] : memref<8x32xf32, #tpu.memory_space<vmem>>, vector<8x32xf32>
      tpu.vector_store %arg16[%c0_37, %c0_38], %47 {strides = array<i32>} : memref<8x32xf32, #tpu.memory_space<vmem>>, vector<8x32xf32>,
    } else {
    }
    %c0 = arith.constant 0 : index
    %c0_1 = arith.constant 0 : index
    %c0_2 = arith.constant 0 : index
    %3 = vector.load %arg2[%c0, %c0_1, %c0_2] : memref<1x8x32xf32, #tpu.memory_space<vmem>>, vector<1x8x32xf32>
    %4 = vector.shape_cast %3 : vector<1x8x32xf32> to vector<8x32xf32>
    %c0_3 = arith.constant 0 : index
    %c0_4 = arith.constant 0 : index
    %c0_5 = arith.constant 0 : index
    %5 = vector.load %arg3[%c0_3, %c0_4, %c0_5] : memref<1x32x8xf32, #tpu.memory_space<vmem>>, vector<1x32x8xf32>
    %6 = vector.shape_cast %5 : vector<1x32x8xf32> to vector<32x8xf32>
    %cst = arith.constant dense<0.000000e+00> : vector<8x8xf32>
    %7 = tpu.matmul %4, %6, %cst {dimension_numbers = #tpu.dot_dimension_numbers<[1], [0], [0], [1], [0, 0, 1, 1], [], []>} : vector<8x32xf32>, vector<32x8xf32>, vector<8x8xf32> -> vector<8x8xf32>
    %c0_6 = arith.constant 0 : index
    %c0_7 = arith.constant 0 : index
    %c0_8 = arith.constant 0 : index
    %8 = vector.load %arg4[%c0_6, %c0_7, %c0_8] : memref<1x1x8xf32, #tpu.memory_space<vmem>>, vector<1x1x8xf32>
    %9 = vector.shape_cast %8 : vector<1x1x8xf32> to vector<1x8xf32>
    %10 = vector.broadcast %9 : vector<1x8xf32> to vector<8x8xf32>
    %11 = arith.addf %7, %10 : vector<8x8xf32>
    %c0_9 = arith.constant 0 : index
    %c0_10 = arith.constant 0 : index
    %c0_11 = arith.constant 0 : index
    %12 = vector.load %arg5[%c0_9, %c0_10, %c0_11] : memref<1x32x8xf32, #tpu.memory_space<vmem>>, vector<1x32x8xf32>
    %13 = vector.shape_cast %12 : vector<1x32x8xf32> to vector<32x8xf32>
    %cst_12 = arith.constant dense<0.000000e+00> : vector<8x8xf32>
    %14 = tpu.matmul %4, %13, %cst_12 {dimension_numbers = #tpu.dot_dimension_numbers<[1], [0], [0], [1], [0, 0, 1, 1], [], []>} : vector<8x32xf32>, vector<32x8xf32>, vector<8x8xf32> -> vector<8x8xf32>
    %c0_13 = arith.constant 0 : index
    %c0_14 = arith.constant 0 : index
    %c0_15 = arith.constant 0 : index
    %15 = vector.load %arg6[%c0_13, %c0_14, %c0_15] : memref<1x1x8xf32, #tpu.memory_space<vmem>>, vector<1x1x8xf32>
    %16 = vector.shape_cast %15 : vector<1x1x8xf32> to vector<1x8xf32>
    %17 = vector.broadcast %16 : vector<1x8xf32> to vector<8x8xf32>
    %18 = arith.addf %14, %17 : vector<8x8xf32>
    %c0_16 = arith.constant 0 : index
    %c0_17 = arith.constant 0 : index
    %c0_18 = arith.constant 0 : index
    %19 = vector.load %arg7[%c0_16, %c0_17, %c0_18] : memref<1x32x8xf32, #tpu.memory_space<vmem>>, vector<1x32x8xf32>
    %20 = vector.shape_cast %19 : vector<1x32x8xf32> to vector<32x8xf32>
    %cst_19 = arith.constant dense<0.000000e+00> : vector<8x8xf32>
    %21 = tpu.matmul %4, %20, %cst_19 {dimension_numbers = #tpu.dot_dimension_numbers<[1], [0], [0], [1], [0, 0, 1, 1], [], []>} : vector<8x32xf32>, vector<32x8xf32>, vector<8x8xf32> -> vector<8x8xf32>
    %c0_20 = arith.constant 0 : index
    %c0_21 = arith.constant 0 : index
    %c0_22 = arith.constant 0 : index
    %22 = vector.load %arg8[%c0_20, %c0_21, %c0_22] : memref<1x1x8xf32, #tpu.memory_space<vmem>>, vector<1x1x8xf32>
    %23 = vector.shape_cast %22 : vector<1x1x8xf32> to vector<1x8xf32>
    %24 = vector.broadcast %23 : vector<1x8xf32> to vector<8x8xf32>
    %25 = arith.addf %21, %24 : vector<8x8xf32>
    %cst_23 = arith.constant dense<0.000000e+00> : vector<8x8xf32>
    %26 = tpu.matmul %11, %18, %cst_23 {dimension_numbers = #tpu.dot_dimension_numbers<[1], [1], [0], [0], [0, 0, 1, 0], [], []>} : vector<8x8xf32>, vector<8x8xf32>, vector<8x8xf32> -> vector<8x8xf32>
    %cst_24 = arith.constant dense<0xFF800000> : vector<8xf32>
    %27 = vector.multi_reduction <maximumf>, %26, %cst_24 [1] : vector<8x8xf32> to vector<8xf32>
    %28 = vector.shape_cast %27 : vector<8xf32> to vector<8x1xf32>
    %29 = vector.broadcast %28 : vector<8x1xf32> to vector<8x8xf32>
    %30 = arith.subf %26, %29 : vector<8x8xf32>
    %31 = math.exp %30 : vector<8x8xf32>
    %cst_25 = arith.constant dense<0.000000e+00> : vector<8xf32>
    %32 = vector.multi_reduction <add>, %31, %cst_25 [1] : vector<8x8xf32> to vector<8xf32>
    %33 = vector.shape_cast %32 : vector<8xf32> to vector<8x1xf32>
    %34 = tpu.reciprocal %33 : vector<8x1xf32> -> vector<8x1xf32>
    %35 = vector.broadcast %34 : vector<8x1xf32> to vector<8x8xf32>
    %36 = arith.mulf %31, %35 : vector<8x8xf32>
    %cst_26 = arith.constant dense<0.000000e+00> : vector<8x8xf32>
    %37 = tpu.matmul %36, %25, %cst_26 {dimension_numbers = #tpu.dot_dimension_numbers<[1], [0], [0], [1], [0, 0, 1, 1], [], []>} : vector<8x8xf32>, vector<8x8xf32>, vector<8x8xf32> -> vector<8x8xf32>
    %c0_27 = arith.constant 0 : index
    %c0_28 = arith.constant 0 : index
    %38 = vector.load %arg16[%c0_27, %c0_28] : memref<8x32xf32, #tpu.memory_space<vmem>>, vector<8x32xf32>
    %c0_29 = arith.constant 0 : index
    %c0_30 = arith.constant 0 : index
    %c0_31 = arith.constant 0 : index
    %39 = vector.load %arg9[%c0_29, %c0_30, %c0_31] : memref<1x8x32xf32, #tpu.memory_space<vmem>>, vector<1x8x32xf32>
    %40 = vector.shape_cast %39 : vector<1x8x32xf32> to vector<8x32xf32>
    %cst_32 = arith.constant dense<0.000000e+00> : vector<8x32xf32>
    %41 = tpu.matmul %37, %40, %cst_32 {dimension_numbers = #tpu.dot_dimension_numbers<[1], [0], [0], [1], [0, 0, 1, 1], [], []>} : vector<8x8xf32>, vector<8x32xf32>, vector<8x32xf32> -> vector<8x32xf32>
    %42 = arith.addf %38, %41 : vector<8x32xf32>
    %c0_33 = arith.constant 0 : index
    %c0_34 = arith.constant 0 : index
    %43 = vector.load %arg16[%c0_33, %c0_34] : memref<8x32xf32, #tpu.memory_space<vmem>>, vector<8x32xf32>
    tpu.vector_store %arg16[%c0_33, %c0_34], %42 {strides = array<i32>} : memref<8x32xf32, #tpu.memory_space<vmem>>, vector<8x32xf32>,
    %c3_i32 = arith.constant 3 : i32
    %44 = arith.cmpi eq, %arg1, %c3_i32 : i32
    %45 = arith.extui %44 : i1 to i32
    %c0_i32_35 = arith.constant 0 : i32
    %46 = arith.cmpi ne, %45, %c0_i32_35 : i32
    scf.if %46 {
      %c0_36 = arith.constant 0 : index
      %c0_37 = arith.constant 0 : index
      %47 = vector.load %arg16[%c0_36, %c0_37] : memref<8x32xf32, #tpu.memory_space<vmem>>, vector<8x32xf32>
      %c0_38 = arith.constant 0 : index
      %c0_39 = arith.constant 0 : index
      %48 = vector.load %arg10[%c0_38, %c0_39] : memref<1x32xf32, #tpu.memory_space<vmem>>, vector<1x32xf32>
      %49 = vector.broadcast %48 : vector<1x32xf32> to vector<8x32xf32>
      %50 = arith.addf %47, %49 : vector<8x32xf32>
      %c0_40 = arith.constant 0 : index
      %c0_41 = arith.constant 0 : index
      %51 = vector.load %arg11[%c0_40, %c0_41] : memref<32x128xf32, #tpu.memory_space<vmem>>, vector<32x128xf32>
      %cst_42 = arith.constant dense<0.000000e+00> : vector<8x128xf32>
      %52 = tpu.matmul %50, %51, %cst_42 {dimension_numbers = #tpu.dot_dimension_numbers<[1], [0], [0], [1], [0, 0, 1, 1], [], []>} : vector<8x32xf32>, vector<32x128xf32>, vector<8x128xf32> -> vector<8x128xf32>
      %c0_43 = arith.constant 0 : index
      %c0_44 = arith.constant 0 : index
      %53 = vector.load %arg12[%c0_43, %c0_44] : memref<1x128xf32, #tpu.memory_space<vmem>>, vector<1x128xf32>
      %54 = vector.broadcast %53 : vector<1x128xf32> to vector<8x128xf32>
      %55 = arith.addf %52, %54 : vector<8x128xf32>
      %cst_45 = arith.constant 0.000000e+00 : f32
      %56 = vector.broadcast %cst_45 : f32 to vector<8x128xf32>
      %57 = arith.maximumf %55, %56 : vector<8x128xf32>
      %c0_46 = arith.constant 0 : index
      %c0_47 = arith.constant 0 : index
      %58 = vector.load %arg13[%c0_46, %c0_47] : memref<128x32xf32, #tpu.memory_space<vmem>>, vector<128x32xf32>
      %cst_48 = arith.constant dense<0.000000e+00> : vector<8x32xf32>
      %59 = tpu.matmul %57, %58, %cst_48 {dimension_numbers = #tpu.dot_dimension_numbers<[1], [0], [0], [1], [0, 0, 1, 1], [], []>} : vector<8x128xf32>, vector<128x32xf32>, vector<8x32xf32> -> vector<8x32xf32>
      %c0_49 = arith.constant 0 : index
      %c0_50 = arith.constant 0 : index
      %60 = vector.load %arg14[%c0_49, %c0_50] : memref<1x32xf32, #tpu.memory_space<vmem>>, vector<1x32xf32>
      %61 = vector.broadcast %60 : vector<1x32xf32> to vector<8x32xf32>
      %62 = arith.addf %59, %61 : vector<8x32xf32>
      %c0_51 = arith.constant 0 : index
      %c0_52 = arith.constant 0 : index
      %c0_53 = arith.constant 0 : index
      %63 = vector.load %arg15[%c0_51, %c0_52, %c0_53] : memref<1x8x32xf32, #tpu.memory_space<vmem>>, vector<1x8x32xf32>
      %64 = vector.shape_cast %63 : vector<1x8x32xf32> to vector<8x32xf32>
      %65 = vector.shape_cast %62 : vector<8x32xf32> to vector<1x8x32xf32>
      tpu.vector_store %arg15[%c0_51, %c0_52, %c0_53], %65 {strides = array<i32>} : memref<1x8x32xf32, #tpu.memory_space<vmem>>, vector<1x8x32xf32>,
    } else {
    }
    return
  }
  func.func @transform_0(%arg0: i32, %arg1: i32) -> (i32, i32, i32) {
    %c0_i32 = arith.constant 0 : i32
    %c0_i32_0 = arith.constant 0 : i32
    %c0_i32_1 = arith.constant 0 : i32
    return %arg0, %c0_i32, %c0_i32_0 : i32, i32, i32
  }
  func.func @transform_1(%arg0: i32, %arg1: i32) -> (i32, i32, i32) {
    %c0_i32 = arith.constant 0 : i32
    %c0_i32_0 = arith.constant 0 : i32
    %c0_i32_1 = arith.constant 0 : i32
    return %arg1, %c0_i32, %c0_i32_0 : i32, i32, i32
  }
  func.func @transform_2(%arg0: i32, %arg1: i32) -> (i32, i32, i32) {
    %c0_i32 = arith.constant 0 : i32
    %c0_i32_0 = arith.constant 0 : i32
    %c0_i32_1 = arith.constant 0 : i32
    return %arg1, %c0_i32, %c0_i32_0 : i32, i32, i32
  }
  func.func @transform_3(%arg0: i32, %arg1: i32) -> (i32, i32, i32) {
    %c0_i32 = arith.constant 0 : i32
    %c0_i32_0 = arith.constant 0 : i32
    %c0_i32_1 = arith.constant 0 : i32
    return %arg1, %c0_i32, %c0_i32_0 : i32, i32, i32
  }
  func.func @transform_4(%arg0: i32, %arg1: i32) -> (i32, i32, i32) {
    %c0_i32 = arith.constant 0 : i32
    %c0_i32_0 = arith.constant 0 : i32
    %c0_i32_1 = arith.constant 0 : i32
    return %arg1, %c0_i32, %c0_i32_0 : i32, i32, i32
  }
  func.func @transform_5(%arg0: i32, %arg1: i32) -> (i32, i32, i32) {
    %c0_i32 = arith.constant 0 : i32
    %c0_i32_0 = arith.constant 0 : i32
    %c0_i32_1 = arith.constant 0 : i32
    return %arg1, %c0_i32, %c0_i32_0 : i32, i32, i32
  }
  func.func @transform_6(%arg0: i32, %arg1: i32) -> (i32, i32, i32) {
    %c0_i32 = arith.constant 0 : i32
    %c0_i32_0 = arith.constant 0 : i32
    %c0_i32_1 = arith.constant 0 : i32
    return %arg1, %c0_i32, %c0_i32_0 : i32, i32, i32
  }
  func.func @transform_7(%arg0: i32, %arg1: i32) -> (i32, i32, i32) {
    %c0_i32 = arith.constant 0 : i32
    %c0_i32_0 = arith.constant 0 : i32
    %c0_i32_1 = arith.constant 0 : i32
    return %arg1, %c0_i32, %c0_i32_0 : i32, i32, i32
  }
  func.func @transform_8(%arg0: i32, %arg1: i32) -> (i32, i32) {
    %c0_i32 = arith.constant 0 : i32
    %c0_i32_0 = arith.constant 0 : i32
    %c0_i32_1 = arith.constant 0 : i32
    return %c0_i32, %c0_i32_0 : i32, i32
  }
  func.func @transform_9(%arg0: i32, %arg1: i32) -> (i32, i32) {
    %c0_i32 = arith.constant 0 : i32
    %c0_i32_0 = arith.constant 0 : i32
    %c0_i32_1 = arith.constant 0 : i32
    return %c0_i32, %c0_i32_0 : i32, i32
  }
  func.func @transform_10(%arg0: i32, %arg1: i32) -> (i32, i32) {
    %c0_i32 = arith.constant 0 : i32
    %c0_i32_0 = arith.constant 0 : i32
    %c0_i32_1 = arith.constant 0 : i32
    return %c0_i32, %c0_i32_0 : i32, i32
  }
  func.func @transform_11(%arg0: i32, %arg1: i32) -> (i32, i32) {
    %c0_i32 = arith.constant 0 : i32
    %c0_i32_0 = arith.constant 0 : i32
    %c0_i32_1 = arith.constant 0 : i32
    return %c0_i32, %c0_i32_0 : i32, i32
  }
  func.func @transform_12(%arg0: i32, %arg1: i32) -> (i32, i32) {
    %c0_i32 = arith.constant 0 : i32
    %c0_i32_0 = arith.constant 0 : i32
    %c0_i32_1 = arith.constant 0 : i32
    return %c0_i32, %c0_i32_0 : i32, i32
  }
  func.func @transform_13(%arg0: i32, %arg1: i32) -> (i32, i32, i32) {
    %c0_i32 = arith.constant 0 : i32
    %c0_i32_0 = arith.constant 0 : i32
    %c0_i32_1 = arith.constant 0 : i32
    return %arg0, %c0_i32, %c0_i32_0 : i32, i32, i32
  }
}

</mosaic_0001>

<bundles_post_ra>
// kernel: tpu_custom_call.1
= control target key start
LH: loop header
LB: loop body
LE: loop exit
PB: predicated region body
PF: predicated region fallthrough
CT: control target
= control target key end

     0   :  { %s2171_s0 = inlined_call_operand.vmem [shape: f32[2,8,32], index: 0, kind: input, shape index: {}]   ;;  %s2172_s1 = inlined_call_operand.vmem [shape: f32[4,32,8], index: 1, kind: input, shape index: {}]   ;;  %s2173_s2 = inlined_call_operand.vmem [shape: f32[4,1,8], index: 2, kind: input, shape index: {}]   ;;  %s2174_s3 = inlined_call_operand.vmem [shape: f32[4,32,8], index: 3, kind: input, shape index: {}]   ;;  %s2175_s4 = inlined_call_operand.vmem [shape: f32[4,1,8], index: 4, kind: input, shape index: {}]   ;;  %s2176_s5 = inlined_call_operand.vmem [shape: f32[4,32,8], index: 5, kind: input, shape index: {}]   ;;  %s2177_s6 = inlined_call_operand.vmem [shape: f32[4,1,8], index: 6, kind: input, shape index: {}]   ;;  %s2178_s7 = inlined_call_operand.vmem [shape: f32[4,8,32], index: 7, kind: input, shape index: {}]   ;;  %s2179_s8 = inlined_call_operand.vmem [shape: f32[1,32], index: 8, kind: input, shape index: {}]   ;;  %s2180_s9 = inlined_call_operand.vmem [shape: f32[32,128], index: 9, kind: input, shape index: {}]   ;;  %s2181_s10 = inlined_call_operand.vmem [shape: f32[1,128], index: 10, kind: input, shape index: {}]   ;;  %s2182_s11 = inlined_call_operand.vmem [shape: f32[128,32], index: 11, kind: input, shape index: {}]   ;;  %s2183_s12 = inlined_call_operand.vmem [shape: f32[1,32], index: 12, kind: input, shape index: {}]   ;;  %s2184_s13 = inlined_call_operand.hbm [shape: f32[2,8,32], index: 13, kind: output, shape index: {}]  }
   0x1   :  { %2199 = sst [smem:[#allocation18_spill]] %s2171_s0 }
   0x2   :  { %2200 = sst [smem:[#allocation19_spill]] %s2172_s1 }
   0x3   :  { %2201 = sst [smem:[#allocation20_spill]] %s2181_s10 }
   0x4   :  { %2202 = sst [smem:[#allocation21_spill]] %s2183_s12 }
   0x5   :  { %2203 = sst [smem:[#allocation22_spill]] %s2184_s13 }
   0x6   :  { %18 = vsyncpa [#allocation4], 0 }
   0x7   :  { %20 = vsyncpa [#allocation4 + $0x1], 0  ;;  %s1888_s25 = smov 0   ;;  %s1890_s26 = smov 0  }
   0x8   :  { %s1892_s27 = smov 0   ;;  %s1894_s28 = smov 0  }
   0x9   :  { %s1896_s29 = smov 0   ;;  %s1898_s30 = smov 0  }
   0xa   :  { %s1900_s14 = smov 0   ;;  %s1902_s15 = smov 0  }
   0xb LB: > { %2204 = sst [smem:[#allocation6_spill]] %s1780_s25  ;;  %s1410_s16 = sadd.s32 4294967295, %s1808_s15   ;;  %s1808_s15 = sphi %s1902_s15, %s26_s15   ;;  %s1804_s14 = sphi %s1900_s14, %s2237_s14   ;;  %s1800_s30 = sphi %s1898_s30, %s2236_s30   ;;  %s1796_s29 = sphi %s1896_s29, %s2235_s29   ;;  %s1792_s28 = sphi %s1894_s28, %s2234_s28   ;;  %s1788_s27 = sphi %s1892_s27, %s2233_s27   ;;  %s1784_s26 = sphi %s1890_s26, %s2232_s26   ;;  %s1780_s25 = sphi %s1888_s25, %s2231_s25  }
   0xc   : > { %2205 = sst [smem:[#allocation7_spill]] %s1784_s26  ;;  %s1411_s17 = sadd.s32 4294967294, %s1808_s15  }
   0xd   : > { %2206 = sst [smem:[#allocation8_spill]] %s1788_s27  ;;  %s35_s18 = sadd.s32 1, %s1800_s30 }
   0xe   : > { %2207 = sst [smem:[#allocation9_spill]] %s1796_s29  ;;  %p36_p0 = scmp.ge.s32.totalorder %s35_s18, 4 }
   0xf   : > { %2208 = sst [smem:[#allocation10_spill]] %s1800_s30  ;;  %s38_s19 = sadd.s32 1, %s1804_s14 }
  0x10   : > { %2209 = sst [smem:[#allocation11_spill]] %s1804_s14  ;;  %p368_p1 = scmp.ne.s32.totalorder %s1788_s27, %s1784_s26 }
  0x11   : > { %2210 = sst [smem:[#allocation12_spill]] %s1808_s15  ;;  %p369_p2 = scmp.eq.s32.totalorder %s1410_s16, 7 }
  0x12   : > { %s2239_s18 = smov (%p36_p0, %s35_s18), 0  ;;  %s2241_s19 = smov (!%p36_p0, %s38_s19), %s1804_s14 }
  0x13   : > { %2211 = sst [smem:[#allocation13_spill]] %s2239_s18  ;;  %p1937_p3 = por %p369_p2, %p368_p1 }
  0x14   : > { %p374_p4 = scmp.ne.s32.totalorder %s1784_s26, %s1780_s25  ;;  %p40_p5 = scmp.ge.s32.totalorder %s2241_s19, 2 }
  0x15   : > { %s2212_s20 = scalar_select %p1937_p3, 1, 0 }
  0x16   : > { %p375_p6 = scmp.eq.s32.totalorder %s1411_s17, 7  ;;  %p1414_p7 = scmp.ge.s32.totalorder %s1808_s15, 1 }
  0x17   : > { %2213 = sst [smem:[#allocation14_spill]] %s2212_s20  ;;  %p464_p8 = scmp.lt.s32.totalorder %s1808_s15, 9 }
  0x18   : > { %s2243_s19 = smov (%p40_p5, %s2241_s19), 0  ;;  %p1947_p9 = por %p375_p6, %p374_p4 }
  0x19   : > { %2214 = sst [smem:[#allocation15_spill]] %s2243_s19  ;;  %p465_p10 = pnand %p1414_p7, %p464_p8 }
  0x1a   : > { %s2215_s21 = scalar_select %p1947_p9, 1, 0 }
  0x1b   : > { %s355_s22 = ssub.s32 %s1804_s14, %s2243_s19  ;;  %s358_s23 = sadd.s32 1, %s1788_s27 }
  0x1c   : > { %2216 = sst [smem:[#allocation16_spill]] %s2215_s21  ;;  %p356_p11 = scmp.eq.s32.totalorder %s355_s22, 0 }
  0x1d   : > { %468 = sbr.rel (%p465_p10) target bundleno = 1691 (0x69b), region = 72  ;;  %s2189_s16 = sand.u32 (!%p465_p10), 1, %s1784_s26  }
  0x1e   : > { %s1955_s24 = scalar_select %p356_p11, %s1788_s27, %s358_s23  }
  0x1f   : > { %p535_p12 = scmp.lt.s32.totalorder (!%p465_p10), %s1796_s29, 1  ;;  %s1961_s17 = sshll.u32 (!%p465_p10), %s2189_s16, 3 }
  0x20   : > { %2217 = sst [smem:[#allocation17_spill]] %s1955_s24  ;;  %p539_p13 = scmp.lt.s32.totalorder (!%p465_p10), %s1792_s28, 3 }
  0x21   : > { %s2218_s0 = sld [smem:[#allocation18_spill]] (!%p465_p10)  ;;  %s2219_s1 = sld [smem:[#allocation19_spill]] (!%p465_p10) }
  0x22   : > { %s534_s26 = scalar_lea.vmem (!%p465_p10), [#allocation3], %s1961_s17  ;;  %p1424_p0 = scmp.ne.s32.totalorder (!%p465_p10), %s1792_s28, 0 }
  0x24   : > { %s536_s18 = scalar_select %p535_p12, %s1796_s29, 1 }
  0x25   : > { %s1966_s19 = scalar_select %p539_p13, %s1792_s28, 3 }
  0x26   : > { %s1416_s22 = sshll.u32 %s536_s18, 3  ;;  %570 = sbr.rel (%p1424_p0) target bundleno = 45 (0x2d), region = 76  ;;  %vm571_vm0 = vcmask (!%p1424_p0), 261120   ;;  %v1810_v0 = vmov (!%p1424_p0), 0.0  }
  0x27   : > { %s1971_s30 = scalar_lea.vmem %s2218_s0, %s1416_s22  ;;  %s1444_s24 = sshll.u32 %s1966_s19, 5  ;;  %572 = vst.msk [vmem:[#allocation2] sm:$0xff] (!%p1424_p0), %vm571_vm0, %v1810_v0 }
  0x28   : > { %s543_s21 = scalar_lea.vmem %s2219_s1, %s1444_s24  ;;  %s551_s29 = scalar_lea.vmem %s2174_s3, %s1444_s24 }
  0x29   : > { %s554_s10 = scalar_lea.vmem %s2175_s4, %s1966_s19  ;;  %s1991_s23 = scalar_lea.vmem %s2176_s5, %s1444_s24 }
  0x2a   : > { %s562_s16 = scalar_lea.vmem %s2177_s6, %s1966_s19  ;;  %s1423_s1 = sshll.u32 %s1966_s19, 3 }
  0x2b   : > { %s2001_s13 = scalar_lea.vmem %s2178_s7, %s1423_s1 }
  0x2d PF: > { %v659_v1 = vld [vmem:[%s551_s29] sm:$0xff]  ;;  %v660_v2 = vld [vmem:[%s551_s29 + $0x8] sm:$0xff]  ;;  %v1811_v4 = vmov 0.0|0.0   ;;  %v661_v7 = vld [vmem:[%s551_s29 + $0x10] sm:$0xff]  ;;  %vm1812_vm1 = vmmov 0   ;;  %v1813_v10 = vmov 0.0  }
  0x2e   : > { %v574_v3 = vld [vmem:[%s543_s21] sm:$0xff]  ;;  %1590 = vmatprep.subr.bf16.mxu1 %v1811_v4  ;;  %v1591_v5 = vpack.c.bf16 %v660_v2, %v659_v1  ;;  %1584 = vmatprep.subr.bf16.mxu0 %v1811_v4  ;;  %v575_v6 = vld [vmem:[%s543_s21 + $0x8] sm:$0xff]  ;;  %v662_v8 = vld [vmem:[%s551_s29 + $0x18] sm:$0xff]  ;;  %vm585_vm2 = vcmask 261120   ;;  %vm821_vm3 = vcmask 64512   ;;  %p1435_p1 = scmp.ne.s32.totalorder %s1792_s28, 3 }
  0x2f   : > { %v1585_v9 = vpack.c.bf16 %v575_v6, %v574_v3  ;;  %1509 = vmatprep.mubr.msk.f32.mxu1 %vm1812_vm1, %v1813_v10  ;;  %v576_v11 = vld [vmem:[%s543_s21 + $0x10] sm:$0xff]  ;;  %v577_v12 = vld [vmem:[%s543_s21 + $0x18] sm:$0xff]  ;;  %1498 = vmatprep.mubr.msk.f32.mxu0 %vm1812_vm1, %v1813_v10  ;;  %v1594_v13 = vpack.c.bf16 %v662_v8, %v661_v7  ;;  %v573_v15 = vld [vmem:[%s1971_s30] sm:$0xff]  ;;  %s2220_s30 = scalar_lea.vmem %s2173_s2, %s1966_s19  ;;  %v1814_v55 = vmov (!%p1435_p1), 0.0|0.0   ;;  %vm1815_vm4 = vmmov (!%p1435_p1), 0   ;;  %s2221_s18 = sld [smem:[#allocation20_spill]] (!%p1435_p1) }
  0x30   : > { %1592 = vmatpush3.bf16.msra.mxu1 %v1591_v5  ;;  %v1588_v14 = vpack.c.bf16 %v577_v12, %v576_v11  ;;  %v1427_v16 = vld [vmem:[%s554_s10] ss:$0 sm:$0xff]  ;;  %v741_v25 = vld [vmem:[%s1991_s23 + $0x8] sm:$0xff]  ;;  %v742_v26 = vld [vmem:[%s1991_s23 + $0x10] sm:$0xff]  ;;  %v1816_v58 = vmov (!%p1435_p1), 0.0  }
  0x31   : > { %1586 = vmatpush3.bf16.msra.mxu0 %v1585_v9  ;;  %1593 = vmatprep.subr.bf16.mxu1 %v1811_v4  ;;  %v1425_v17 = vld [vmem:[%s2220_s30] ss:$0 sm:$0xff]  ;;  %v743_v28 = vld [vmem:[%s1991_s23 + $0x18] sm:$0xff]  ;;  %v1073_v53 = vld [vmem:[%s2180_s9 + $0x8] sm:$0xff] (!%p1435_p1) }
  0x32   : > { %1587 = vmatprep.subr.bf16.mxu0 %v1811_v4  ;;  %v740_v24 = vld [vmem:[%s1991_s23] sm:$0xff]  ;;  %v1600_v29 = vpack.c.bf16 %v743_v28, %v742_v26  ;;  %v1074_v54 = vld [vmem:[%s2180_s9 + $0x10] sm:$0xff] (!%p1435_p1)  ;;  %v1075_v57 = vld [vmem:[%s2180_s9 + $0x18] sm:$0xff] (!%p1435_p1)  ;;  %s2222_s23 = sld [smem:[#allocation21_spill]] (!%p1435_p1) }
  0x33   : > { %v1597_v27 = vpack.c.bf16 %v741_v25, %v740_v24  ;;  %v1429_v39 = vld [vmem:[%s562_s16] ss:$0 sm:$0xff]  ;;  %v1158_v60 = vld [vmem:[%s2182_s11 + $0x8] sm:$0xff] (!%p1435_p1)  ;;  %v1159_v61 = vld [vmem:[%s2182_s11 + $0x10] sm:$0xff] (!%p1435_p1)  ;;  %v1606_v62 = vpack.c.bf16 (!%p1435_p1), %v1075_v57, %v1074_v54 }
  0x34   : > { %1595 = vmatpush3.bf16.msra.mxu1 %v1594_v13  ;;  %v983_v42 = vld [vmem:[%s2001_s13] sm:$0xff]  ;;  %v1160_v2 = vld [vmem:[%s2182_s11 + $0x18] sm:$0xff] (!%p1435_p1)  ;;  %v1162_v6 = vld [vmem:[%s2182_s11 + $0x28] sm:$0xff] (!%p1435_p1) }
  0x35   : > { %1589 = vmatpush3.bf16.msra.mxu0 %v1588_v14  ;;  %1523 = vmatprep.subr.mxu1 %v1813_v10  ;;  %v982_v48 = vld [vmem:[#allocation2] sm:$0xff]  ;;  %v1612_v3 = vpack.c.bf16 (!%p1435_p1), %v1160_v2, %v1159_v61  ;;  %v1163_v8 = vld [vmem:[%s2182_s11 + $0x30] sm:$0xff] (!%p1435_p1)  ;;  %v1164_v9 = vld [vmem:[%s2182_s11 + $0x38] sm:$0xff] (!%p1435_p1) }
  0x36   : > { %1596 = vmatprep.subr.bf16.mxu0 %v1811_v4  ;;  %v1072_v52 = vld [vmem:[%s2180_s9] sm:$0xff] (!%p1435_p1)  ;;  %v1166_v12 = vld [vmem:[%s2182_s11 + $0x48] sm:$0xff] (!%p1435_p1)  ;;  %v1167_v14 = vld [vmem:[%s2182_s11 + $0x50] sm:$0xff] (!%p1435_p1) }
  0x37   : > { %1510 = vmatmul.mubr.msk.f32.vlgmr.msra.gmra.mrb[0].mxu1 %vm585_vm2, %v573_v15  ;;  %v1603_v56 = vpack.c.bf16 (!%p1435_p1), %v1073_v53, %v1072_v52  ;;  %v1157_v59 = vld [vmem:[%s2182_s11] sm:$0xff] (!%p1435_p1) }
  0x38   : > { %1499 = vmatmul.mubr.msk.f32.vlgmr.msra.gmra.mrb[0].mxu0 %vm585_vm2, %v573_v15  ;;  %1525 = vmatprep.mubr.msk.f32.mxu1 %vm1812_vm1, %v1813_v10  ;;  %v1436_v0 = vld [vmem:[%s2179_s8] ss:$0 sm:$0xff] (!%p1435_p1)  ;;  %v1609_v1 = vpack.c.bf16 (!%p1435_p1), %v1158_v60, %v1157_v59 }
  0x39   : > { %1520 = vmatprep.mubr.msk.f32.mxu0 %vm1812_vm1, %v1813_v10  ;;  %1598 = vmatpush3.bf16.msra.mxu0 %v1597_v27  ;;  %v1161_v5 = vld [vmem:[%s2182_s11 + $0x20] sm:$0xff] (!%p1435_p1) }
  0x3a   : > { %1599 = vmatprep.subr.bf16.mxu0 %v1811_v4  ;;  %v1615_v7 = vpack.c.bf16 (!%p1435_p1), %v1162_v6, %v1161_v5  ;;  %v1165_v11 = vld [vmem:[%s2182_s11 + $0x40] sm:$0xff] (!%p1435_p1) }
  0x3b   : > { %v1621_v13 = vpack.c.bf16 (!%p1435_p1), %v1166_v12, %v1165_v11  ;;  %v1439_v28 = vld [vmem:[%s2222_s23] ss:$0 sm:$0xff] (!%p1435_p1) }
  0x3d   : > { %1601 = vmatpush3.bf16.msra.mxu0 %v1600_v29 }
  0x3e   : > { %1533 = vmatprep.subr.mxu0 %v1813_v10 }
  0x40   : > { %1521 = vmatmul.mubr.msk.f32.vlgmr.msra.gmra.mrb[2].mxu0 %vm585_vm2, %v573_v15  ;;  %v1168_v15 = vld [vmem:[%s2182_s11 + $0x58] sm:$0xff] (!%p1435_p1) }
  0x41   : > { %1535 = vmatprep.mubr.msk.f32.mxu0 %vm1812_vm1, %v1813_v10  ;;  %1534 = vmatpush3.msra.mxu0 %v983_v42 }
  0x42   : > { %1602 = vmatprep.subr.bf16.mxu0 (!%p1435_p1), %v1814_v55 }
 0x10a   : > { %v736_v18 = vpop.f32.mrb[0].mxu1 }
 0x10b   : > { %v737_v19 = vadd.f32 %v1427_v16, %v736_v18  ;;  %v1511_v20 = vpop.f32.mrb[1].mxu1  ;;  %v655_v21 = vpop.f32.mrb[0].mxu0  ;;  %v1624_v16 = vpack.c.bf16 (!%p1435_p1), %v1168_v15, %v1167_v14  ;;  %v1170_v18 = vld [vmem:[%s2182_s11 + $0x68] sm:$0xff] (!%p1435_p1) }
 0x10c   : > { %v656_v22 = vadd.f32 %v1425_v17, %v655_v21  ;;  %v1500_v23 = vpop.f32.mrb[1].mxu0  ;;  %v1169_v17 = vld [vmem:[%s2182_s11 + $0x60] sm:$0xff] (!%p1435_p1)  ;;  %v1171_v20 = vld [vmem:[%s2182_s11 + $0x70] sm:$0xff] (!%p1435_p1)  ;;  %v1172_v21 = vld [vmem:[%s2182_s11 + $0x78] sm:$0xff] (!%p1435_p1) }
 0x10d   : > { %1524 = vmatpush3.xpose.msk.msra.mxu1 %vm821_vm3, %v737_v19  ;;  %v1627_v19 = vpack.c.bf16 (!%p1435_p1), %v1170_v18, %v1169_v17  ;;  %v1437_v23 = vld [vmem:[%s2221_s18] ss:$0 sm:$0xff] (!%p1435_p1) }
 0x10e   : > { %1528 = vmatprep.subr.mxu1 %v1813_v10 }
 0x110   : > { %1526 = vmatmul.mubr.msk.f32.vlgmr.msra.gmra.mrb[2].mxu1 %vm821_vm3, %v656_v22  ;;  %v1630_v22 = vpack.c.bf16 (!%p1435_p1), %v1172_v21, %v1171_v20 }
 0x111   : > { %1530 = vmatprep.mubr.msk.f32.mxu1 %vm1812_vm1, %v1813_v10  ;;  %v1618_v10 = vpack.c.bf16 (!%p1435_p1), %v1164_v9, %v1163_v8 }
 0x113   : > { %v817_v38 = vpop.f32.mrb[2].mxu0 }
 0x114   : > { %v1522_v40 = vpop.f32.mrb[3].mxu0  ;;  %v818_v41 = vadd.f32 %v1429_v39, %v817_v38 }
 0x116   : > { %1529 = vmatpush3.msra.mxu1 %v818_v41 }
 0x117   : > { %1608 = vmatprep.subr.bf16.mxu1 (!%p1435_p1), %v1814_v55 }
 0x1e3   : > { %v894_v30 = vpop.f32.mrb[2].mxu1 }
 0x1e4   : > { %v1527_v31 = vpop.f32.mrb[3].mxu1  ;;  %v898_v32 = vsel %vm821_vm3, %v894_v30, -inf }
 0x1e5   : > { %899 = vmax.xlane.f32.xlu0 %v898_v32 }
 0x272   : > { %v900_v33 = vpop.xlane.xlu0 %899 }
 0x273   : > { %v901_v34 = vsub.f32 %v894_v30, %v900_v33 }
 0x275   : > { %v902_v35 = vmul.f32 1.442695, %v901_v34 }
 0x277   : > { %1710 = vpow2.f32 %v902_v35 }
 0x281   : > { %v1711_v36 = vpop.eup %1710 }
 0x282   : > { %v904_v37 = vsel %vm821_vm3, %v1711_v36, 0.0 }
 0x283   : > { %905 = vadd.xlane.f32.xlu0 %v904_v37 }
 0x310   : > { %v906_v43 = vpop.xlane.xlu0 %905 }
 0x311   : > { %1712 = vrcp.f32 %v906_v43 }
 0x31b   : > { %v1713_v44 = vpop.eup %1712 }
 0x31c   : > { %v908_v45 = vmul.f32 %v1713_v44, %v1711_v36 }
 0x31e   : > { %1531 = vmatmul.mubr.msk.f32.vlgmr.msra.gmra.mrb[4].mxu1 %vm821_vm3, %v908_v45 }
 0x31f   : > { %1581 = vmatprep.mubr.msk.f32.mxu1 (!%p1435_p1), %vm1815_vm4, %v1816_v58  ;;  %1610 = vmatpush3.bf16.msra.mxu1 (!%p1435_p1), %v1609_v1 }
 0x320   : > { %1611 = vmatprep.subr.bf16.mxu1 (!%p1435_p1), %v1814_v55 }
 0x323   : > { %1613 = vmatpush3.bf16.msra.mxu1 (!%p1435_p1), %v1612_v3 }
 0x324   : > { %1614 = vmatprep.subr.bf16.mxu1 (!%p1435_p1), %v1814_v55 }
 0x327   : > { %1616 = vmatpush3.bf16.msra.mxu1 (!%p1435_p1), %v1615_v7 }
 0x328   : > { %1617 = vmatprep.subr.bf16.mxu1 (!%p1435_p1), %v1814_v55 }
 0x32b   : > { %1619 = vmatpush3.bf16.msra.mxu1 (!%p1435_p1), %v1618_v10 }
 0x32c   : > { %1620 = vmatprep.subr.bf16.mxu1 (!%p1435_p1), %v1814_v55 }
 0x32f   : > { %1622 = vmatpush3.bf16.msra.mxu1 (!%p1435_p1), %v1621_v13 }
 0x330   : > { %1623 = vmatprep.subr.bf16.mxu1 (!%p1435_p1), %v1814_v55 }
 0x333   : > { %1625 = vmatpush3.bf16.msra.mxu1 (!%p1435_p1), %v1624_v16 }
 0x334   : > { %1626 = vmatprep.subr.bf16.mxu1 (!%p1435_p1), %v1814_v55 }
 0x337   : > { %1628 = vmatpush3.bf16.msra.mxu1 (!%p1435_p1), %v1627_v19 }
 0x338   : > { %1629 = vmatprep.subr.bf16.mxu1 (!%p1435_p1), %v1814_v55 }
 0x33b   : > { %1631 = vmatpush3.bf16.msra.mxu1 (!%p1435_p1), %v1630_v22 }
 0x3f1   : > { %v978_v46 = vpop.f32.mrb[4].mxu1 }
 0x3f2   : > { %v1532_v47 = vpop.f32.mrb[5].mxu1  ;;  %1536 = vmatmul.mubr.msk.f32.vlgmr.msra.gmra.mrb[4].mxu0 %vm821_vm3, %v978_v46 }
 0x3f3   : > { %1546 = vmatprep.mubr.msk.f32.mxu0 (!%p1435_p1), %vm1815_vm4, %v1816_v58  ;;  %1604 = vmatpush3.bf16.msra.mxu0 (!%p1435_p1), %v1603_v56 }
 0x3f4   : > { %1605 = vmatprep.subr.bf16.mxu0 (!%p1435_p1), %v1814_v55 }
 0x3f7   : > { %1607 = vmatpush3.bf16.msra.mxu0 (!%p1435_p1), %v1606_v62 }
 0x4c2   : > { %1062 = sbr.rel (%p1435_p1) target bundleno = 1665 (0x681), region = 80 }
 0x4c5   : > { %v1053_v49 = vpop.f32.mrb[4].mxu0 }
 0x4c6   : > { %v1057_v50 = vadd.f32 %v1053_v49, %v982_v48  ;;  %v1537_v51 = vpop.f32.mrb[5].mxu0 }
 0x4c8   : > { %1058 = vst.msk [vmem:[#allocation2] sm:$0xff] %vm585_vm2, %v1057_v50 }
 0x4cf   : > { %v1063_v63 = vld [vmem:[#allocation2] sm:$0xff] }
 0x4d0   : > { %v1071_v4 = vadd.f32 %v1436_v0, %v1063_v63 }
 0x4d2   : > { %1547 = vmatmul.mubr.msk.f32.vlgmr.msra.gmra.mrb[0].mxu0 %vm585_vm2, %v1071_v4 }
 0x5a5   : > { %v1152_v24 = vpop.f32.mrb[0].mxu0 }
 0x5a6   : > { %v1153_v25 = vadd.f32 %v1437_v23, %v1152_v24  ;;  %v1548_v26 = vpop.f32.mrb[1].mxu0 }
 0x5a8   : > { %v1156_v27 = vmax.f32 %v1153_v25, 0.0 }
 0x5aa   : > { %1582 = vmatmul.mubr.f32.vlgmr.msra.gmra.mrb[0].mxu1 %v1156_v27 }
 0x67d   : > { %v1246_v29 = vpop.f32.mrb[0].mxu1 }
 0x67e   : > { %v1247_v30 = vadd.f32 %v1439_v28, %v1246_v29  ;;  %v1583_v31 = vpop.f32.mrb[1].mxu1 }
 0x680   : > { %1250 = vst.msk [vmem:[%s534_s26] sm:$0xff] %vm585_vm2, %v1247_v30 }
 0x681 PF: > { %s2223_s28 = sld [smem:[#allocation9_spill]]  ;;  %s2226_s1 = sld [smem:[#allocation22_spill]] }
 0x682   : > { %s2224_s27 = sld [smem:[#allocation7_spill]]  ;;  %s1265_s29 = sshll.u32 %s534_s26, 4  ;;  %s1266_s29 = int_to_ptr.vmem [resolvable:$true] %s1265_s29 }
 0x683   : > { %s1714_s20 = scalar_lea.vmem %s1266_s29, 128  ;;  %s1817_s13 = smov [#allocation3]  }
 0x684   : > { %p1715_p2 = scmp.ne.s32.totalorder %s1266_s29, %s1714_s20  ;;  %s1718_s19 = sshll.u32 %s1817_s13, 4  ;;  %s1719_s19 = int_to_ptr.vmem [resolvable:$false] %s1718_s19 }
 0x685   : > { %s1720_s21 = scalar_lea.vmem %s1719_s19, 256  ;;  %p1721_p6 = scmp.lt.s32.totalorder %s1266_s29, %s1719_s19 }
 0x686   : > { %p1716_p4 = pnand %p1715_p2, %p1937_p3  ;;  %p1722_p7 = scmp.lt.s32.totalorder %s1720_s21, %s1714_s20 }
 0x687   : > { %s1441_s25 = sshll.u32 %s2223_s28, 7 }
 0x688   : > { %s2120_s12 = scalar_lea.hbm %s2226_s1, %s1441_s25  ;;  %s2227_s30 = sand.u32 1, %s2224_s27  }
 0x689   : > { %s1252_s10 = scalar_lea.sflag [#allocation4], %s2227_s30  ;;  %p1717_p5 = pneg %p1716_p4 }
 0x68a   : > { %p1723_p8 = por %p1722_p7, %p1721_p6 }
 0x68c   : > { %p1724_p10 = pnand %p1723_p8, %p1717_p5 }
 0x68e   : > { %1727 = shalt.err (!%p1724_p10)
}
 0x68f   : > { %s1728_s17 = scalar_lea.hbm %s2120_s12, 128  ;;  %s1732_s18 = scalar_lea.hbm %s2226_s1, 256 }
 0x690   : > { %p1729_p11 = scmp.ne.s32.totalorder %s2120_s12, %s1728_s17  ;;  %p1733_p0 = scmp.lt.u32.totalorder %s2120_s12, %s2226_s1 }
 0x691   : > { %p1734_p1 = scmp.lt.u32.totalorder %s1732_s18, %s1728_s17  ;;  %p1736_p4 = scmp.lt.u32.totalorder %s1728_s17, %s2120_s12 }
 0x692   : > { %p1730_p12 = pnand %p1729_p11, %p1937_p3 }
 0x693   : > { %p1735_p2 = por %p1734_p1, %p1733_p0 }
 0x694   : > { %p1731_p13 = pneg %p1730_p12 }
 0x695   : > { %p1737_p5 = por %p1736_p4, %p1735_p2 }
 0x697   : > { %p1738_p6 = pnand %p1737_p5, %p1731_p13 }
 0x699   : > { %1741 = shalt.err (!%p1738_p6)
}
 0x69a   : > { %1632 = dma.vmem_to_hbm [thread:$0]  (%p1937_p3), %s1266_s29, 128, %s2120_s12, %s1252_s10  }
 0x69b PF: > { %s2228_s23 = sld [smem:[#allocation12_spill]]  ;;  %s2229_s28 = sld [smem:[#allocation6_spill]] }
 0x6a1   : > { %p1638_p7 = scmp.ge.s32.totalorder %s2228_s23, 2  ;;  %s1277_s25 = sand.u32 1, %s2229_s28  }
 0x6a2   : > { %s1278_s15 = scalar_lea.sflag [#allocation4], %s1277_s25 }
 0x6a3   : > { %p1635_p8 = pnand %p1638_p7, %p1947_p9 }
 0x6a5   : > { %1775 = dma.done.wait (!%p1635_p8), %s1278_s15, 128  }
 0x6a6   : > { %1777 = vsyncadd (!%p1635_p8), %s1278_s15, 4294967168  ;;  %s26_s15 = sadd.s32 1, %s2228_s23   ;;  %s2231_s25 = sld [smem:[#allocation7_spill]] }
 0x6a7   : > { %p23_p10 = scmp.ge.s32.totalorder %s26_s15, 10   ;;  %s2232_s26 = sld [smem:[#allocation8_spill]] }
 0x6a8   : > { %s2233_s27 = sld [smem:[#allocation17_spill]]  ;;  %s2234_s28 = sld [smem:[#allocation10_spill]] }
 0x6a9   : > { %s2235_s29 = sld [smem:[#allocation11_spill]]  ;;  %s2236_s30 = sld [smem:[#allocation13_spill]] }
 0x6aa   : > { %s2237_s14 = sld [smem:[#allocation15_spill]]  ;;  %25 = sbr.rel (!%p23_p10) target bundleno = 11 (0xb), region = 136 }
 0x6b1   :  { %1283 = vsyncpa [#allocation4], 1 }
 0x6b2   :  { %1285 = vsyncpa [#allocation4 + $0x1], 1 }

</bundles_post_ra>
